<compile_context>
chip_gen: v5e
topology: v5e:2x2
jax: 0.10.0
libtpu: 0.0.40
codegen_flags: <defaults>
</compile_context>

<pallas_src>
import numpy as np
import jax
import jax.numpy as jnp
from jax.experimental import pallas as pl
from jax.experimental.pallas import tpu as pltpu


OUT_PAD = 8  # fc2 output zero-padded to 8 lanes (real cols are 0..3)


# ----------------------------------------------------------------------------
# Pallas kernel: the whole forward pass for one batch tile.
# ----------------------------------------------------------------------------
def cnn_kernel(x_ref, w1_ref, b1_ref, w2_ref, b2_ref, w3_ref, b3_ref,
               fw1_ref, fb1_ref, fw2_ref, fb2_ref, out_ref):
    x = x_ref[...]                                                    # (BM, 52)

    # conv1: Conv1d(1, 4, 5, stride=1) as dense matmul + ReLU -> (BM, 4*48)
    h = jnp.dot(x, w1_ref[...], preferred_element_type=jnp.float32) + b1_ref[...]
    h = jnp.maximum(h, 0.0)

    # conv2: Conv1d(4, 4, 4, stride=2) as dense matmul + ReLU -> (BM, 4*23)
    h = jnp.dot(h, w2_ref[...], preferred_element_type=jnp.float32) + b2_ref[...]
    h = jnp.maximum(h, 0.0)

    # conv3: Conv1d(4, 4, 4, stride=1) as dense matmul + ReLU -> (BM, 4*20)
    h = jnp.dot(h, w3_ref[...], preferred_element_type=jnp.float32) + b3_ref[...]
    h = jnp.maximum(h, 0.0)

    # fc1: Linear(80, 16) + ReLU
    h = jnp.dot(h, fw1_ref[...], preferred_element_type=jnp.float32) + fb1_ref[...]
    h = jnp.maximum(h, 0.0)

    # fc2: Linear(16, 4), zero-padded to OUT_PAD lanes.
    out_ref[...] = (jnp.dot(h, fw2_ref[...], preferred_element_type=jnp.float32)
                    + fb2_ref[...])


# ----------------------------------------------------------------------------
# Glue: lower Conv1d weights to dense (Toeplitz) matrices over the flattened
# channel-major layout:  dense[ci*L_in + stride*t + k, co*L_out + t] = w[co,ci,k]
# ----------------------------------------------------------------------------
def conv1d_to_dense(w_np, l_in, stride):
    c_out, c_in, k_sz = w_np.shape
    l_out = (l_in - k_sz) // stride + 1
    dense = np.zeros((c_in * l_in, c_out * l_out), dtype=np.float32)
    for co in range(c_out):
        for ci in range(c_in):
            for t in range(l_out):
                for k in range(k_sz):
                    dense[ci * l_in + stride * t + k, co * l_out + t] = w_np[co, ci, k]
    return dense, l_out


def make_params(key):
    """Deterministic parameter init (PyTorch-style uniform(-1/sqrt(fan_in), ...))."""
    def uinit(k, shape, fan_in):
        bound = 1.0 / np.sqrt(fan_in)
        return jax.random.uniform(k, shape, jnp.float32, -bound, bound)

    ks = jax.random.split(key, 10)
    # conv weights / biases  (C_out, C_in, K)
    cw1 = np.asarray(uinit(ks[0], (4, 1, 5), 1 * 5))
    cb1 = np.asarray(uinit(ks[1], (4,), 1 * 5))
    cw2 = np.asarray(uinit(ks[2], (4, 4, 4), 4 * 4))
    cb2 = np.asarray(uinit(ks[3], (4,), 4 * 4))
    cw3 = np.asarray(uinit(ks[4], (4, 4, 4), 4 * 4))
    cb3 = np.asarray(uinit(ks[5], (4,), 4 * 4))
    # fc weights (stored transposed: (in, out)) / biases
    fw1 = np.asarray(uinit(ks[6], (4 * 20, 16), 4 * 20))
    fb1 = np.asarray(uinit(ks[7], (16,), 4 * 20))
    fw2 = np.asarray(uinit(ks[8], (16, 4), 16))
    fb2 = np.asarray(uinit(ks[9], (4,), 16))

    # Dense (Toeplitz) forms of the convs over the flat (C*L) layout.
    W1, L1 = conv1d_to_dense(cw1, 52, 1)    # (52, 4*48),  L1 = 48
    W2, L2 = conv1d_to_dense(cw2, L1, 2)    # (192, 4*23), L2 = 23
    W3, L3 = conv1d_to_dense(cw3, L2, 1)    # (92, 4*20),  L3 = 20
    B1 = np.repeat(cb1, L1)[None, :]        # (1, 192) channel-major bias
    B2 = np.repeat(cb2, L2)[None, :]        # (1, 92)
    B3 = np.repeat(cb3, L3)[None, :]        # (1, 80)

    # fc2 zero-padded to OUT_PAD output lanes.
    fw2_p = np.zeros((16, OUT_PAD), dtype=np.float32)
    fw2_p[:, :4] = fw2
    fb2_p = np.zeros((1, OUT_PAD), dtype=np.float32)
    fb2_p[0, :4] = fb2

    params = tuple(jnp.asarray(a) for a in
                   (W1, B1, W2, B2, W3, B3, fw1, fb1[None, :], fw2_p, fb2_p))
    raw = (cw1, cb1, cw2, cb2, cw3, cb3, fw1, fb1, fw2, fb2)
    return params, raw


# ----------------------------------------------------------------------------
# Generation-aware TensorCore count (1 on v5e/v6e, 2 on v7x). Best-effort.
# ----------------------------------------------------------------------------
def _num_tensorcores():
    try:
        info = pltpu.get_tpu_info()
        for attr in ("num_cores", "cores_per_chip", "num_tensorcores"):
            n = getattr(info, attr, None)
            if n:
                return int(n)
    except Exception:
        pass
    try:
        kind = jax.devices()[0].device_kind.lower()
        if "v7" in kind or "7x" in kind:
            return 2
    except Exception:
        pass
    return 1


# ----------------------------------------------------------------------------
# Wrapper: pallas_call tiled over batch (weights resident in VMEM).
# ----------------------------------------------------------------------------
def cnn_forward(x, params, bm=2048):
    B = x.shape[0]
    cores = _num_tensorcores()

    def round_up8(v):
        return ((v + 7) // 8) * 8

    bm_cap = max(8, min(int(bm), 2048))

    # Single-TC chips (v5e/v6e): one tile as large as possible (big MXU M,
    # fewest grid steps).  Multi-TC chips (v7x): split only when each tile can
    # keep M >= 256, so both TensorCores get real work.
    if cores > 1 and B >= cores * 256:
        tile = min(bm_cap, round_up8(pl.cdiv(B, cores)))
    else:
        tile = min(bm_cap, round_up8(B))
    tile = max(8, tile)

    n_tiles = pl.cdiv(B, tile)
    Bp = n_tiles * tile
    if Bp != B:
        x = jnp.pad(x, ((0, Bp - B), (0, 0)))

    # Weights/biases: whole arrays held resident in VMEM (no per-step DMA).
    weight_spec = pl.BlockSpec(memory_space=pltpu.MemorySpace.VMEM)
    in_specs = [pl.BlockSpec((tile, 52), lambda i: (i, 0))] + [weight_spec] * len(params)

    # Only use CORE_PARALLEL when the chip actually has >1 TensorCore and we
    # have >1 tile; otherwise the grid is a serial loop and semantics don't matter.
    if cores > 1 and n_tiles > 1:
        semantics = (getattr(pltpu, "CORE_PARALLEL", "parallel"),)
    else:
        semantics = ("arbitrary",)

    flops_per_row = 2 * (52 * 192 + 192 * 92 + 92 * 80 + 80 * 16 + 16 * OUT_PAD)
    weight_bytes = 4 * sum(int(np.prod(p.shape)) for p in params)
    cost = pl.CostEstimate(
        flops=flops_per_row * Bp,
        transcendentals=0,
        bytes_accessed=4 * Bp * (52 + OUT_PAD) + weight_bytes,
    )

    out = pl.pallas_call(
        cnn_kernel,
        out_shape=jax.ShapeDtypeStruct((Bp, OUT_PAD), jnp.float32),
        grid=(n_tiles,),
        in_specs=in_specs,
        out_specs=pl.BlockSpec((tile, OUT_PAD), lambda i: (i, 0)),
        compiler_params=pltpu.CompilerParams(dimension_semantics=semantics),
        cost_estimate=cost,
    )(x, *params)

    return out[:B, :4]


# ----------------------------------------------------------------------------
# Pure-JAX reference (mirrors the PyTorch forward) for a correctness check.
# ----------------------------------------------------------------------------
def cnn_reference(x, raw):
    cw1, cb1, cw2, cb2, cw3, cb3, fw1, fb1, fw2, fb2 = [jnp.asarray(a) for a in raw]
    prec = jax.lax.Precision.HIGHEST

    def conv1d(h, w, b, stride):
        out = jax.lax.conv_general_dilated(
            h, w, window_strides=(stride,), padding="VALID",
            dimension_numbers=("NCH", "OIH", "NCH"), precision=prec)
        return out + b[None, :, None]

    h = x.reshape(-1, 1, 52)
    h = jnp.maximum(conv1d(h, cw1, cb1, 1), 0.0)
    h = jnp.maximum(conv1d(h, cw2, cb2, 2), 0.0)
    h = jnp.maximum(conv1d(h, cw3, cb3, 1), 0.0)
    h = h.reshape(-1, 4 * 20)
    h = jnp.maximum(jnp.dot(h, fw1, precision=prec) + fb1, 0.0)
    return jnp.dot(h, fw2, precision=prec) + fb2


if __name__ == "__main__":
    key = jax.random.PRNGKey(0)
    pkey, xkey = jax.random.split(key)

    params, raw = make_params(pkey)

    B = 64
    x = jax.random.normal(xkey, (B, 52), dtype=jnp.float32)

    out = jax.block_until_ready(cnn_forward(x, params))
    ref = jax.block_until_ready(cnn_reference(x, raw))

    # Kernel uses default (single-pass bf16) MXU precision with f32 accumulation
    # across 5 chained matmuls; compare against an f32 HIGHEST-precision
    # reference with a matching (documented) tolerance.
    np.testing.assert_allclose(np.asarray(out), np.asarray(ref), rtol=2e-2, atol=2e-2)

    print("KERNEL_OK")
</pallas_src>

<mosaic_0001>
module attributes {stable_mosaic.version = 11 : i64} {
  func.func @cnn_kernel(%arg0: i32, %arg1: memref<64x52xf32, #tpu.memory_space<vmem>>, %arg2: memref<52x192xf32, #tpu.memory_space<vmem>>, %arg3: memref<1x192xf32, #tpu.memory_space<vmem>>, %arg4: memref<192x92xf32, #tpu.memory_space<vmem>>, %arg5: memref<1x92xf32, #tpu.memory_space<vmem>>, %arg6: memref<92x80xf32, #tpu.memory_space<vmem>>, %arg7: memref<1x80xf32, #tpu.memory_space<vmem>>, %arg8: memref<80x16xf32, #tpu.memory_space<vmem>>, %arg9: memref<1x16xf32, #tpu.memory_space<vmem>>, %arg10: memref<16x8xf32, #tpu.memory_space<vmem>>, %arg11: memref<1x8xf32, #tpu.memory_space<vmem>>, %arg12: memref<64x8xf32, #tpu.memory_space<vmem>>) attributes {dimension_semantics = [#tpu.dimension_semantics<arbitrary>], iteration_bounds = array<i64: 1>, scalar_prefetch = 0 : i64, scratch_operands = 0 : i64, tpu.core_type = #tpu.core_type<tc>, window_params = [{transform_indices = @transform_0, window_bounds = array<i64: 64, 52>}, {pipeline_mode = #tpu.pipeline_mode<synchronous>, transform_indices = @transform_1, window_bounds = array<i64: 52, 192>}, {pipeline_mode = #tpu.pipeline_mode<synchronous>, transform_indices = @transform_2, window_bounds = array<i64: 1, 192>}, {pipeline_mode = #tpu.pipeline_mode<synchronous>, transform_indices = @transform_3, window_bounds = array<i64: 192, 92>}, {pipeline_mode = #tpu.pipeline_mode<synchronous>, transform_indices = @transform_4, window_bounds = array<i64: 1, 92>}, {pipeline_mode = #tpu.pipeline_mode<synchronous>, transform_indices = @transform_5, window_bounds = array<i64: 92, 80>}, {pipeline_mode = #tpu.pipeline_mode<synchronous>, transform_indices = @transform_6, window_bounds = array<i64: 1, 80>}, {pipeline_mode = #tpu.pipeline_mode<synchronous>, transform_indices = @transform_7, window_bounds = array<i64: 80, 16>}, {pipeline_mode = #tpu.pipeline_mode<synchronous>, transform_indices = @transform_8, window_bounds = array<i64: 1, 16>}, {pipeline_mode = #tpu.pipeline_mode<synchronous>, transform_indices = @transform_9, window_bounds = array<i64: 16, 8>}, {pipeline_mode = #tpu.pipeline_mode<synchronous>, transform_indices = @transform_10, window_bounds = array<i64: 1, 8>}, {transform_indices = @transform_11, window_bounds = array<i64: 64, 8>}]} {
    %c0 = arith.constant 0 : index
    %c0_0 = arith.constant 0 : index
    %0 = vector.load %arg1[%c0, %c0_0] : memref<64x52xf32, #tpu.memory_space<vmem>>, vector<64x52xf32>
    %c0_1 = arith.constant 0 : index
    %c0_2 = arith.constant 0 : index
    %1 = vector.load %arg2[%c0_1, %c0_2] : memref<52x192xf32, #tpu.memory_space<vmem>>, vector<52x192xf32>
    %cst = arith.constant dense<0.000000e+00> : vector<64x192xf32>
    %2 = tpu.matmul %0, %1, %cst {dimension_numbers = #tpu.dot_dimension_numbers<[1], [0], [0], [1], [0, 0, 1, 1], [], []>} : vector<64x52xf32>, vector<52x192xf32>, vector<64x192xf32> -> vector<64x192xf32>
    %c0_3 = arith.constant 0 : index
    %c0_4 = arith.constant 0 : index
    %3 = vector.load %arg3[%c0_3, %c0_4] : memref<1x192xf32, #tpu.memory_space<vmem>>, vector<1x192xf32>
    %4 = vector.broadcast %3 : vector<1x192xf32> to vector<64x192xf32>
    %5 = arith.addf %2, %4 : vector<64x192xf32>
    %cst_5 = arith.constant 0.000000e+00 : f32
    %6 = vector.broadcast %cst_5 : f32 to vector<64x192xf32>
    %7 = arith.maximumf %5, %6 : vector<64x192xf32>
    %c0_6 = arith.constant 0 : index
    %c0_7 = arith.constant 0 : index
    %8 = vector.load %arg4[%c0_6, %c0_7] : memref<192x92xf32, #tpu.memory_space<vmem>>, vector<192x92xf32>
    %cst_8 = arith.constant dense<0.000000e+00> : vector<64x92xf32>
    %9 = tpu.matmul %7, %8, %cst_8 {dimension_numbers = #tpu.dot_dimension_numbers<[1], [0], [0], [1], [0, 0, 1, 1], [], []>} : vector<64x192xf32>, vector<192x92xf32>, vector<64x92xf32> -> vector<64x92xf32>
    %c0_9 = arith.constant 0 : index
    %c0_10 = arith.constant 0 : index
    %10 = vector.load %arg5[%c0_9, %c0_10] : memref<1x92xf32, #tpu.memory_space<vmem>>, vector<1x92xf32>
    %11 = vector.broadcast %10 : vector<1x92xf32> to vector<64x92xf32>
    %12 = arith.addf %9, %11 : vector<64x92xf32>
    %cst_11 = arith.constant 0.000000e+00 : f32
    %13 = vector.broadcast %cst_11 : f32 to vector<64x92xf32>
    %14 = arith.maximumf %12, %13 : vector<64x92xf32>
    %c0_12 = arith.constant 0 : index
    %c0_13 = arith.constant 0 : index
    %15 = vector.load %arg6[%c0_12, %c0_13] : memref<92x80xf32, #tpu.memory_space<vmem>>, vector<92x80xf32>
    %cst_14 = arith.constant dense<0.000000e+00> : vector<64x80xf32>
    %16 = tpu.matmul %14, %15, %cst_14 {dimension_numbers = #tpu.dot_dimension_numbers<[1], [0], [0], [1], [0, 0, 1, 1], [], []>} : vector<64x92xf32>, vector<92x80xf32>, vector<64x80xf32> -> vector<64x80xf32>
    %c0_15 = arith.constant 0 : index
    %c0_16 = arith.constant 0 : index
    %17 = vector.load %arg7[%c0_15, %c0_16] : memref<1x80xf32, #tpu.memory_space<vmem>>, vector<1x80xf32>
    %18 = vector.broadcast %17 : vector<1x80xf32> to vector<64x80xf32>
    %19 = arith.addf %16, %18 : vector<64x80xf32>
    %cst_17 = arith.constant 0.000000e+00 : f32
    %20 = vector.broadcast %cst_17 : f32 to vector<64x80xf32>
    %21 = arith.maximumf %19, %20 : vector<64x80xf32>
    %c0_18 = arith.constant 0 : index
    %c0_19 = arith.constant 0 : index
    %22 = vector.load %arg8[%c0_18, %c0_19] : memref<80x16xf32, #tpu.memory_space<vmem>>, vector<80x16xf32>
    %cst_20 = arith.constant dense<0.000000e+00> : vector<64x16xf32>
    %23 = tpu.matmul %21, %22, %cst_20 {dimension_numbers = #tpu.dot_dimension_numbers<[1], [0], [0], [1], [0, 0, 1, 1], [], []>} : vector<64x80xf32>, vector<80x16xf32>, vector<64x16xf32> -> vector<64x16xf32>
    %c0_21 = arith.constant 0 : index
    %c0_22 = arith.constant 0 : index
    %24 = vector.load %arg9[%c0_21, %c0_22] : memref<1x16xf32, #tpu.memory_space<vmem>>, vector<1x16xf32>
    %25 = vector.broadcast %24 : vector<1x16xf32> to vector<64x16xf32>
    %26 = arith.addf %23, %25 : vector<64x16xf32>
    %cst_23 = arith.constant 0.000000e+00 : f32
    %27 = vector.broadcast %cst_23 : f32 to vector<64x16xf32>
    %28 = arith.maximumf %26, %27 : vector<64x16xf32>
    %c0_24 = arith.constant 0 : index
    %c0_25 = arith.constant 0 : index
    %29 = vector.load %arg10[%c0_24, %c0_25] : memref<16x8xf32, #tpu.memory_space<vmem>>, vector<16x8xf32>
    %cst_26 = arith.constant dense<0.000000e+00> : vector<64x8xf32>
    %30 = tpu.matmul %28, %29, %cst_26 {dimension_numbers = #tpu.dot_dimension_numbers<[1], [0], [0], [1], [0, 0, 1, 1], [], []>} : vector<64x16xf32>, vector<16x8xf32>, vector<64x8xf32> -> vector<64x8xf32>
    %c0_27 = arith.constant 0 : index
    %c0_28 = arith.constant 0 : index
    %31 = vector.load %arg11[%c0_27, %c0_28] : memref<1x8xf32, #tpu.memory_space<vmem>>, vector<1x8xf32>
    %32 = vector.broadcast %31 : vector<1x8xf32> to vector<64x8xf32>
    %33 = arith.addf %30, %32 : vector<64x8xf32>
    %c0_29 = arith.constant 0 : index
    %c0_30 = arith.constant 0 : index
    %34 = vector.load %arg12[%c0_29, %c0_30] : memref<64x8xf32, #tpu.memory_space<vmem>>, vector<64x8xf32>
    tpu.vector_store %arg12[%c0_29, %c0_30], %33 {strides = array<i32>} : memref<64x8xf32, #tpu.memory_space<vmem>>, vector<64x8xf32>,
    return
  }
  func.func @transform_0(%arg0: i32) -> (i32, i32) {
    %c0_i32 = arith.constant 0 : i32
    %c0_i32_0 = arith.constant 0 : i32
    return %arg0, %c0_i32 : i32, i32
  }
  func.func @transform_1(%arg0: i32) -> (i32, i32) {
    %c0_i32 = arith.constant 0 : i32
    %c0_i32_0 = arith.constant 0 : i32
    %c0_i32_1 = arith.constant 0 : i32
    return %c0_i32, %c0_i32_0 : i32, i32
  }
  func.func @transform_2(%arg0: i32) -> (i32, i32) {
    %c0_i32 = arith.constant 0 : i32
    %c0_i32_0 = arith.constant 0 : i32
    %c0_i32_1 = arith.constant 0 : i32
    return %c0_i32, %c0_i32_0 : i32, i32
  }
  func.func @transform_3(%arg0: i32) -> (i32, i32) {
    %c0_i32 = arith.constant 0 : i32
    %c0_i32_0 = arith.constant 0 : i32
    %c0_i32_1 = arith.constant 0 : i32
    return %c0_i32, %c0_i32_0 : i32, i32
  }
  func.func @transform_4(%arg0: i32) -> (i32, i32) {
    %c0_i32 = arith.constant 0 : i32
    %c0_i32_0 = arith.constant 0 : i32
    %c0_i32_1 = arith.constant 0 : i32
    return %c0_i32, %c0_i32_0 : i32, i32
  }
  func.func @transform_5(%arg0: i32) -> (i32, i32) {
    %c0_i32 = arith.constant 0 : i32
    %c0_i32_0 = arith.constant 0 : i32
    %c0_i32_1 = arith.constant 0 : i32
    return %c0_i32, %c0_i32_0 : i32, i32
  }
  func.func @transform_6(%arg0: i32) -> (i32, i32) {
    %c0_i32 = arith.constant 0 : i32
    %c0_i32_0 = arith.constant 0 : i32
    %c0_i32_1 = arith.constant 0 : i32
    return %c0_i32, %c0_i32_0 : i32, i32
  }
  func.func @transform_7(%arg0: i32) -> (i32, i32) {
    %c0_i32 = arith.constant 0 : i32
    %c0_i32_0 = arith.constant 0 : i32
    %c0_i32_1 = arith.constant 0 : i32
    return %c0_i32, %c0_i32_0 : i32, i32
  }
  func.func @transform_8(%arg0: i32) -> (i32, i32) {
    %c0_i32 = arith.constant 0 : i32
    %c0_i32_0 = arith.constant 0 : i32
    %c0_i32_1 = arith.constant 0 : i32
    return %c0_i32, %c0_i32_0 : i32, i32
  }
  func.func @transform_9(%arg0: i32) -> (i32, i32) {
    %c0_i32 = arith.constant 0 : i32
    %c0_i32_0 = arith.constant 0 : i32
    %c0_i32_1 = arith.constant 0 : i32
    return %c0_i32, %c0_i32_0 : i32, i32
  }
  func.func @transform_10(%arg0: i32) -> (i32, i32) {
    %c0_i32 = arith.constant 0 : i32
    %c0_i32_0 = arith.constant 0 : i32
    %c0_i32_1 = arith.constant 0 : i32
    return %c0_i32, %c0_i32_0 : i32, i32
  }
  func.func @transform_11(%arg0: i32) -> (i32, i32) {
    %c0_i32 = arith.constant 0 : i32
    %c0_i32_0 = arith.constant 0 : i32
    return %arg0, %c0_i32 : i32, i32
  }
}

</mosaic_0001>

<bundles_post_ra>
// kernel: tpu_custom_call.1
= control target key start
LH: loop header
LB: loop body
LE: loop exit
PB: predicated region body
PF: predicated region fallthrough
CT: control target
= control target key end

     0   :  { %vm91_vm0 = vcmask 1043456   ;;  %vm66_vm1 = vcmask 424960   ;;  %vm224_vm2 = vcmask 523264   ;;  %vm355_vm3 = vcmask 752640   ;;  %s1069_s1 = inlined_call_operand.vmem [shape: f32[52,192], index: 1, kind: input, shape index: {}]   ;;  %s1070_s0 = inlined_call_operand.vmem [shape: f32[64,52], index: 0, kind: input, shape index: {}]   ;;  %s1071_s3 = inlined_call_operand.vmem [shape: f32[192,92], index: 3, kind: input, shape index: {}]   ;;  %s1072_s4 = inlined_call_operand.vmem [shape: f32[1,92], index: 4, kind: input, shape index: {}]   ;;  %s1073_s2 = inlined_call_operand.vmem [shape: f32[1,192], index: 2, kind: input, shape index: {}]   ;;  %s1074_s6 = inlined_call_operand.vmem [shape: f32[1,80], index: 6, kind: input, shape index: {}]   ;;  %s1075_s5 = inlined_call_operand.vmem [shape: f32[92,80], index: 5, kind: input, shape index: {}]   ;;  %s1076_s7 = inlined_call_operand.vmem [shape: f32[80,16], index: 7, kind: input, shape index: {}]   ;;  %s1077_s8 = inlined_call_operand.vmem [shape: f32[1,16], index: 8, kind: input, shape index: {}]   ;;  %s1078_s9 = inlined_call_operand.vmem [shape: f32[16,8], index: 9, kind: input, shape index: {}]   ;;  %s1079_s10 = inlined_call_operand.vmem [shape: f32[1,8], index: 10, kind: input, shape index: {}]   ;;  %s1080_s11 = inlined_call_operand.vmem [shape: f32[64,8], index: 11, kind: output, shape index: {}]  }
   0x1   :  { %v58_v0 = vld [vmem:[%s1069_s1 + $0x60] sm:$0xf]  ;;  %v56_v1 = vld [vmem:[%s1069_s1 + $0x50] sm:$0xff]  ;;  %v59_v2 = vld [vmem:[%s1069_s1 + $0x68] sm:$0xf]  ;;  %vm446_vm4 = vcmask 654336  }
   0x2   :  { %605 = vmatpush.msk.msra.mxu0 %vm91_vm0, %v58_v0  ;;  %614 = vmatpush.msk.msra.mxu1 %vm91_vm0, %v59_v2  ;;  %v57_v3 = vld [vmem:[%s1069_s1 + $0x58] sm:$0xff]  ;;  %v54_v4 = vld [vmem:[%s1069_s1 + $0x40] sm:$0xff]  ;;  %v55_v5 = vld [vmem:[%s1069_s1 + $0x48] sm:$0xff]  ;;  %vm526_vm5 = vcmask 130048   ;;  %vm592_vm6 = vcmask 64512  }
   0x3   :  { %656 = vmatpush.msk.msra.mxu2 %vm91_vm0, %v58_v0  ;;  %v52_v6 = vld [vmem:[%s1069_s1 + $0x30] sm:$0xff]  ;;  %v53_v7 = vld [vmem:[%s1069_s1 + $0x38] sm:$0xff]  ;;  %v50_v8 = vld [vmem:[%s1069_s1 + $0x20] sm:$0xff] }
   0x4   :  { %108 = vmatpush.msra.mxu0 %v56_v1  ;;  %149 = vmatpush.msra.mxu1 %v57_v3  ;;  %v51_v9 = vld [vmem:[%s1069_s1 + $0x28] sm:$0xff]  ;;  %v48_v10 = vld [vmem:[%s1069_s1 + $0x10] sm:$0xff]  ;;  %v49_v11 = vld [vmem:[%s1069_s1 + $0x18] sm:$0xff] }
   0x5   :  { %657 = vmatpush.msra.mxu2 %v56_v1  ;;  %v46_v12 = vld [vmem:[%s1069_s1] sm:$0xff]  ;;  %v47_v13 = vld [vmem:[%s1069_s1 + $0x8] sm:$0xff]  ;;  %v41_v15 = vld [vmem:[%s1070_s0 + $0x18] sm:$0xff] }
   0x6   :  { %109 = vmatpush.msra.mxu0 %v54_v4  ;;  %150 = vmatpush.msra.mxu1 %v55_v5  ;;  %v38_v14 = vld [vmem:[%s1070_s0] sm:$0xff]  ;;  %v39_v16 = vld [vmem:[%s1070_s0 + $0x8] sm:$0xff]  ;;  %v40_v18 = vld [vmem:[%s1070_s0 + $0x10] sm:$0xff] }
   0x7   :  { %658 = vmatpush.msra.mxu2 %v54_v4  ;;  %v42_v17 = vld [vmem:[%s1070_s0 + $0x20] sm:$0xff]  ;;  %v43_v19 = vld [vmem:[%s1070_s0 + $0x28] sm:$0xff]  ;;  %v44_v20 = vld [vmem:[%s1070_s0 + $0x30] sm:$0xff] }
   0x8   :  { %110 = vmatpush.msra.mxu0 %v52_v6  ;;  %151 = vmatpush.msra.mxu1 %v53_v7  ;;  %v211_v21 = vld [vmem:[%s1071_s3 + $0x78] sm:$0xff]  ;;  %v210_v22 = vld [vmem:[%s1071_s3 + $0x70] sm:$0xff]  ;;  %v209_v23 = vld [vmem:[%s1071_s3 + $0x68] sm:$0xff] }
   0x9   :  { %659 = vmatpush.msra.mxu2 %v52_v6  ;;  %v208_v24 = vld [vmem:[%s1071_s3 + $0x60] sm:$0xff]  ;;  %v207_v25 = vld [vmem:[%s1071_s3 + $0x58] sm:$0xff]  ;;  %v206_v27 = vld [vmem:[%s1071_s3 + $0x50] sm:$0xff] }
   0xa   :  { %111 = vmatpush.msra.mxu0 %v50_v8  ;;  %152 = vmatpush.msra.mxu1 %v51_v9  ;;  %v45_v26 = vld [vmem:[%s1070_s0 + $0x38] sm:$0xff]  ;;  %v205_v28 = vld [vmem:[%s1071_s3 + $0x48] sm:$0xff]  ;;  %v204_v29 = vld [vmem:[%s1071_s3 + $0x40] sm:$0xff] }
   0xb   :  { %660 = vmatpush.msra.mxu2 %v50_v8  ;;  %v203_v30 = vld [vmem:[%s1071_s3 + $0x38] sm:$0xff]  ;;  %v202_v31 = vld [vmem:[%s1071_s3 + $0x30] sm:$0xff]  ;;  %v201_v32 = vld [vmem:[%s1071_s3 + $0x28] sm:$0xff] }
   0xc   :  { %112 = vmatpush.msra.mxu0 %v48_v10  ;;  %153 = vmatpush.msra.mxu1 %v49_v11  ;;  %v200_v33 = vld [vmem:[%s1071_s3 + $0x20] sm:$0xff]  ;;  %v199_v34 = vld [vmem:[%s1071_s3 + $0x18] sm:$0xff]  ;;  %v198_v35 = vld [vmem:[%s1071_s3 + $0x10] sm:$0xff] }
   0xd   :  { %661 = vmatpush.msra.mxu2 %v48_v10  ;;  %v219_v36 = vld [vmem:[%s1071_s3 + $0xb8] sm:$0xff]  ;;  %v197_v37 = vld [vmem:[%s1071_s3 + $0x8] sm:$0xff]  ;;  %v218_v38 = vld [vmem:[%s1071_s3 + $0xb0] sm:$0xff] }
   0xe   :  { %113 = vmatpush.msra.mxu0 %v46_v12  ;;  %154 = vmatpush.msra.mxu1 %v47_v13  ;;  %v196_v39 = vld [vmem:[%s1071_s3] sm:$0xff]  ;;  %v217_v40 = vld [vmem:[%s1071_s3 + $0xa8] sm:$0xff]  ;;  %v215_v42 = vld [vmem:[%s1071_s3 + $0x98] sm:$0xff] }
   0xf   :  { %606 = vmatmul.msk.f32.vlgmr.msra.gmra.mxu0 %vm66_vm1, %v38_v14  ;;  %615 = vmatmul.msk.f32.vlgmr.msra.gmra.mxu1 %vm66_vm1, %v38_v14  ;;  %v216_v41 = vld [vmem:[%s1071_s3 + $0xa0] sm:$0xff]  ;;  %v214_v43 = vld [vmem:[%s1071_s3 + $0x90] sm:$0xff]  ;;  %v213_v44 = vld [vmem:[%s1071_s3 + $0x88] sm:$0xff] }
  0x10   :  { %662 = vmatpush.msra.mxu2 %v46_v12  ;;  %663 = vmatpush.msra.mxu3 %v219_v36  ;;  %v212_v45 = vld [vmem:[%s1071_s3 + $0x80] sm:$0xff] }
  0x11   :  { %609 = vmatmul.msk.f32.vlgmr.msra.gmra.mxu2 %vm66_vm1, %v41_v15  ;;  %v60_v46 = vld [vmem:[%s1073_s2] sm:$0x3] }
  0x12   :  { %249 = vmatpush.msrb.mxu2 %v211_v21  ;;  %664 = vmatpush.msra.mxu3 %v218_v38  ;;  %v62_v47 = vperm.slane %v60_v46, 0  ;;  %v63_v52 = vperm.slane %v60_v46, 1  ;;  %v341_v46 = vld [vmem:[%s1075_s5 + $0x10] sm:$0xff] }
  0x14   :  { %250 = vmatpush.msrb.mxu2 %v210_v22  ;;  %665 = vmatpush.msra.mxu3 %v217_v40 }
  0x16   :  { %251 = vmatpush.msrb.mxu2 %v209_v23  ;;  %666 = vmatpush.msra.mxu3 %v216_v41 }
  0x17   :  { %607 = vmatmul.msk.f32.gmra.mxu0 %vm66_vm1, %v39_v16  ;;  %616 = vmatmul.msk.f32.gmra.mxu1 %vm66_vm1, %v39_v16 }
  0x18   :  { %252 = vmatpush.msrb.mxu2 %v208_v24  ;;  %667 = vmatpush.msra.mxu3 %v215_v42 }
  0x19   :  { %610 = vmatmul.msk.f32.gmra.mxu2 %vm66_vm1, %v42_v17 }
  0x1a   :  { %253 = vmatpush.msrb.mxu2 %v207_v25  ;;  %668 = vmatpush.msra.mxu3 %v214_v43 }
  0x1c   :  { %254 = vmatpush.msrb.mxu2 %v206_v27  ;;  %669 = vmatpush.msra.mxu3 %v213_v44 }
  0x1e   :  { %255 = vmatpush.msrb.mxu2 %v205_v28  ;;  %670 = vmatpush.msra.mxu3 %v212_v45 }
  0x1f   :  { %608 = vmatmul.msk.f32.gmra.mxu0 %vm66_vm1, %v40_v18  ;;  %617 = vmatmul.msk.f32.gmra.mxu1 %vm66_vm1, %v40_v18 }
  0x20   :  { %256 = vmatpush.msrb.mxu2 %v204_v29 }
  0x21   :  { %611 = vmatmul.msk.f32.gmra.mxu2 %vm66_vm1, %v43_v19 }
  0x22   :  { %257 = vmatpush.msrb.mxu2 %v203_v30 }
  0x24   :  { %258 = vmatpush.msrb.mxu2 %v202_v31 }
  0x26   :  { %259 = vmatpush.msrb.mxu2 %v201_v32 }
  0x27   :  { %618 = vmatmul.msk.f32.gmra.mxu1 %vm66_vm1, %v41_v15 }
  0x28   :  { %260 = vmatpush.msrb.mxu2 %v200_v33 }
  0x29   :  { %612 = vmatmul.msk.f32.gmra.mxu2 %vm66_vm1, %v44_v20 }
  0x2a   :  { %261 = vmatpush.msrb.mxu2 %v199_v34 }
  0x2c   :  { %262 = vmatpush.msrb.mxu2 %v198_v35  ;;  %v350_v35 = vld [vmem:[%s1075_s5 + $0x58] sm:$0xf] }
  0x2d   :  { %631 = vmatpush.msk.msrb.mxu0 %vm91_vm0, %v350_v35 }
  0x2e   :  { %263 = vmatpush.msrb.mxu2 %v197_v37 }
  0x2f   :  { %619 = vmatmul.msk.f32.gmra.mxu1 %vm66_vm1, %v42_v17 }
  0x30   :  { %264 = vmatpush.msrb.mxu2 %v196_v39  ;;  %v347_v39 = vld [vmem:[%s1075_s5 + $0x40] sm:$0xff] }
  0x31   :  { %613 = vmatmul.msk.f32.gmra.mxu2 %vm66_vm1, %v45_v26 }
  0x32   :  { %298 = vmatpush.msra.mxu2 %v219_v36  ;;  %v349_v36 = vld [vmem:[%s1075_s5 + $0x50] sm:$0xff] }
  0x33   :  { %388 = vmatpush.msrb.mxu0 %v349_v36 }
  0x34   :  { %299 = vmatpush.msra.mxu2 %v218_v38  ;;  %v348_v38 = vld [vmem:[%s1075_s5 + $0x48] sm:$0xff] }
  0x35   :  { %389 = vmatpush.msrb.mxu0 %v348_v38 }
  0x36   :  { %300 = vmatpush.msra.mxu2 %v217_v40  ;;  %v346_v40 = vld [vmem:[%s1075_s5 + $0x38] sm:$0xff] }
  0x37   :  { %620 = vmatmul.msk.f32.gmra.mxu1 %vm66_vm1, %v43_v19  ;;  %390 = vmatpush.msrb.mxu0 %v347_v39 }
  0x38   :  { %301 = vmatpush.msra.mxu2 %v216_v41  ;;  %v345_v41 = vld [vmem:[%s1075_s5 + $0x30] sm:$0xff] }
  0x39   :  { %391 = vmatpush.msrb.mxu0 %v346_v40 }
  0x3a   :  { %302 = vmatpush.msra.mxu2 %v215_v42 }
  0x3b   :  { %392 = vmatpush.msrb.mxu0 %v345_v41 }
  0x3c   :  { %303 = vmatpush.msra.mxu2 %v214_v43  ;;  %v344_v43 = vld [vmem:[%s1075_s5 + $0x28] sm:$0xff] }
  0x3d   :  { %393 = vmatpush.msrb.mxu0 %v344_v43 }
  0x3e   :  { %304 = vmatpush.msra.mxu2 %v213_v44  ;;  %v343_v44 = vld [vmem:[%s1075_s5 + $0x20] sm:$0xff] }
  0x3f   :  { %621 = vmatmul.msk.f32.gmra.mxu1 %vm66_vm1, %v44_v20  ;;  %394 = vmatpush.msrb.mxu0 %v343_v44 }
  0x40   :  { %305 = vmatpush.msra.mxu2 %v212_v45  ;;  %v342_v45 = vld [vmem:[%s1075_s5 + $0x18] sm:$0xff] }
  0x41   :  { %395 = vmatpush.msrb.mxu0 %v342_v45  ;;  %v521_v45 = vld [vmem:[%s1078_s9 + $0x8] sm:$0xff] }
  0x42   :  { %681 = vmatpush.msrb.mxu3 %v521_v45 }
  0x43   :  { %396 = vmatpush.msrb.mxu0 %v341_v46  ;;  %v520_v46 = vld [vmem:[%s1078_s9] sm:$0xff] }
  0x44   :  { %682 = vmatpush.msrb.mxu3 %v520_v46 }
  0x47   :  { %622 = vmatmul.msk.f32.gmra.mxu1 %vm66_vm1, %v45_v26 }
  0x8c   :  { %v115_v48 = vpop.f32.mrf.mxu0  ;;  %v156_v49 = vpop.f32.mrf.mxu1 }
  0x8d   :  { %v116_v50 = vadd.f32 %v115_v48, %v62_v47  ;;  %v157_v31 = vadd.f32 %v156_v49, %v63_v52  ;;  %v340_v48 = vld [vmem:[%s1075_s5 + $0x8] sm:$0xff]  ;;  %v339_v49 = vld [vmem:[%s1075_s5] sm:$0xff] }
  0x8e   :  { %397 = vmatpush.msrb.mxu0 %v340_v48 }
  0x8f   :  { %v180_v51 = vmax.f32 %v116_v50, 0.0  ;;  %v181_v32 = vmax.f32 %v157_v31, 0.0 }
  0x90   :  { %398 = vmatpush.msrb.mxu0 %v339_v49 }
  0x91   :  { %265 = vmatmul.f32.vlgmr.msrb.gmra.mxu2 %v180_v51 }
  0x94   :  { %v118_v53 = vpop.f32.mrf.mxu0  ;;  %v159_v54 = vpop.f32.mrf.mxu1 }
  0x95   :  { %v119_v55 = vadd.f32 %v118_v53, %v62_v47  ;;  %v160_v56 = vadd.f32 %v159_v54, %v63_v52  ;;  %v124_v57 = vpop.f32.mrf.mxu2  ;;  %v957_v54 = vld [vmem:[%s1072_s4] ss:$0 sm:$0xff] }
  0x96   :  { %v125_v3 = vadd.f32 %v124_v57, %v62_v47 }
  0x97   :  { %v182_v58 = vmax.f32 %v119_v55, 0.0  ;;  %v183_v59 = vmax.f32 %v160_v56, 0.0 }
  0x98   :  { %v186_v5 = vmax.f32 %v125_v3, 0.0 }
  0x99   :  { %268 = vmatmul.f32.gmra.mxu2 %v182_v58  ;;  %624 = vmatmul.msk.f32.vlgmr.msra.gmra.mxu3 %vm224_vm2, %v183_v59 }
  0x9c   :  { %v121_v60 = vpop.f32.mrf.mxu0  ;;  %v162_v61 = vpop.f32.mrf.mxu1 }
  0x9d   :  { %v122_v62 = vadd.f32 %v121_v60, %v62_v47  ;;  %v163_v63 = vadd.f32 %v162_v61, %v63_v52  ;;  %v127_v2 = vpop.f32.mrf.mxu2 }
  0x9e   :  { %v128_v8 = vadd.f32 %v127_v2, %v62_v47 }
  0x9f   :  { %v184_v0 = vmax.f32 %v122_v62, 0.0  ;;  %v185_v1 = vmax.f32 %v163_v63, 0.0 }
  0xa0   :  { %v188_v11 = vmax.f32 %v128_v8, 0.0  ;;  %v441_v8 = vld [vmem:[%s1076_s7 + $0x48] sm:$0xff] }
  0xa1   :  { %271 = vmatmul.f32.gmra.mxu2 %v184_v0  ;;  %625 = vmatmul.msk.f32.gmra.mxu3 %vm224_vm2, %v185_v1 }
  0xa2   :  { %477 = vmatpush.msra.mxu0 %v441_v8  ;;  %671 = vmatpush.msrb.mxu1 %v441_v8 }
  0xa4   :  { %v165_v4 = vpop.f32.mrf.mxu1 }
  0xa5   :  { %v166_v6 = vadd.f32 %v165_v4, %v63_v52  ;;  %v130_v9 = vpop.f32.mrf.mxu2 }
  0xa6   :  { %v131_v14 = vadd.f32 %v130_v9, %v62_v47  ;;  %v440_v9 = vld [vmem:[%s1076_s7 + $0x40] sm:$0xff] }
  0xa7   :  { %v187_v7 = vmax.f32 %v166_v6, 0.0  ;;  %478 = vmatpush.msra.mxu0 %v440_v9  ;;  %672 = vmatpush.msrb.mxu1 %v440_v9 }
  0xa8   :  { %v190_v17 = vmax.f32 %v131_v14, 0.0 }
  0xa9   :  { %274 = vmatmul.f32.gmra.mxu2 %v186_v5  ;;  %626 = vmatmul.msk.f32.gmra.mxu3 %vm224_vm2, %v187_v7 }
  0xac   :  { %v168_v10 = vpop.f32.mrf.mxu1 }
  0xad   :  { %v169_v12 = vadd.f32 %v168_v10, %v63_v52  ;;  %v133_v16 = vpop.f32.mrf.mxu2 }
  0xae   :  { %v134_v20 = vadd.f32 %v133_v16, %v62_v47  ;;  %v437_v16 = vld [vmem:[%s1076_s7 + $0x28] sm:$0xff] }
  0xaf   :  { %v189_v13 = vmax.f32 %v169_v12, 0.0 }
  0xb0   :  { %v192_v22 = vmax.f32 %v134_v20, 0.0  ;;  %v434_v20 = vld [vmem:[%s1076_s7 + $0x10] sm:$0xff] }
  0xb1   :  { %277 = vmatmul.f32.gmra.mxu2 %v188_v11  ;;  %627 = vmatmul.msk.f32.gmra.mxu3 %vm224_vm2, %v189_v13  ;;  %v439_v11 = vld [vmem:[%s1076_s7 + $0x38] sm:$0xff]  ;;  %v438_v13 = vld [vmem:[%s1076_s7 + $0x30] sm:$0xff] }
  0xb2   :  { %479 = vmatpush.msra.mxu0 %v439_v11  ;;  %673 = vmatpush.msrb.mxu1 %v439_v11 }
  0xb4   :  { %v171_v15 = vpop.f32.mrf.mxu1  ;;  %480 = vmatpush.msra.mxu0 %v438_v13  ;;  %674 = vmatpush.msrb.mxu1 %v438_v13 }
  0xb5   :  { %v172_v18 = vadd.f32 %v171_v15, %v63_v52  ;;  %v136_v24 = vpop.f32.mrf.mxu2 }
  0xb6   :  { %v137_v26 = vadd.f32 %v136_v24, %v62_v47  ;;  %481 = vmatpush.msra.mxu0 %v437_v16  ;;  %675 = vmatpush.msrb.mxu1 %v437_v16  ;;  %v433_v24 = vld [vmem:[%s1076_s7 + $0x8] sm:$0xff] }
  0xb7   :  { %v191_v19 = vmax.f32 %v172_v18, 0.0 }
  0xb8   :  { %v194_v28 = vmax.f32 %v137_v26, 0.0 }
  0xb9   :  { %280 = vmatmul.f32.gmra.mxu2 %v190_v17  ;;  %628 = vmatmul.msk.f32.gmra.mxu3 %vm224_vm2, %v191_v19  ;;  %v436_v17 = vld [vmem:[%s1076_s7 + $0x20] sm:$0xff]  ;;  %v435_v19 = vld [vmem:[%s1076_s7 + $0x18] sm:$0xff] }
  0xba   :  { %482 = vmatpush.msra.mxu0 %v436_v17  ;;  %676 = vmatpush.msrb.mxu1 %v436_v17 }
  0xbc   :  { %v174_v21 = vpop.f32.mrf.mxu1  ;;  %483 = vmatpush.msra.mxu0 %v435_v19  ;;  %677 = vmatpush.msrb.mxu1 %v435_v19 }
  0xbd   :  { %v175_v23 = vadd.f32 %v174_v21, %v63_v52 }
  0xbe   :  { %484 = vmatpush.msra.mxu0 %v434_v20  ;;  %678 = vmatpush.msrb.mxu1 %v434_v20  ;;  %v686_v20 = vld [vmem:[%s1079_s10] ss:$0 sm:$0xff] }
  0xbf   :  { %v193_v25 = vmax.f32 %v175_v23, 0.0 }
  0xc0   :  { %485 = vmatpush.msra.mxu0 %v433_v24  ;;  %679 = vmatpush.msrb.mxu1 %v433_v24 }
  0xc1   :  { %283 = vmatmul.f32.gmra.mxu2 %v192_v22  ;;  %629 = vmatmul.msk.f32.gmra.mxu3 %vm224_vm2, %v193_v25  ;;  %v432_v25 = vld [vmem:[%s1076_s7] sm:$0xff] }
  0xc2   :  { %486 = vmatpush.msra.mxu0 %v432_v25  ;;  %680 = vmatpush.msrb.mxu1 %v432_v25 }
  0xc4   :  { %v177_v27 = vpop.f32.mrf.mxu1 }
  0xc5   :  { %v178_v29 = vadd.f32 %v177_v27, %v63_v52 }
  0xc7   :  { %v195_v30 = vmax.f32 %v178_v29, 0.0 }
  0xc9   :  { %286 = vmatmul.f32.gmra.mxu2 %v194_v28  ;;  %630 = vmatmul.msk.f32.gmra.mxu3 %vm224_vm2, %v195_v30 }
  0xd1   :  { %623 = vmatmul.msk.f32.vlgmr.msra.gmra.mxu2 %vm224_vm2, %v181_v32  ;;  %v684_v32 = vld [vmem:[%s1074_s6] ss:$0 sm:$0xff] }
 0x114   :  { %v266_v33 = vpop.f32.mrf.mxu2 }
 0x115   :  { %v267_v55 = vadd.f32 %v957_v54, %v266_v33 }
 0x11c   :  { %v269_v34 = vpop.f32.mrf.mxu2  ;;  %v310_v52 = vpop.f32.mrf.mxu3 }
 0x11d   :  { %v270_v59 = vadd.f32 %v957_v54, %v269_v34 }
 0x11f   :  { %v311_v61 = vadd.f32 %v310_v52, %v270_v59  ;;  %v685_v59 = vld [vmem:[%s1077_s8] ss:$0 sm:$0xff] }
 0x121   :  { %v332_v62 = vmax.f32 %v311_v61, 0.0 }
 0x124   :  { %v272_v37 = vpop.f32.mrf.mxu2  ;;  %v313_v58 = vpop.f32.mrf.mxu3 }
 0x125   :  { %v273_v63 = vadd.f32 %v957_v54, %v272_v37 }
 0x127   :  { %v314_v1 = vadd.f32 %v313_v58, %v273_v63 }
 0x129   :  { %v333_v2 = vmax.f32 %v314_v1, 0.0 }
 0x12c   :  { %v275_v42 = vpop.f32.mrf.mxu2  ;;  %v316_v0 = vpop.f32.mrf.mxu3 }
 0x12d   :  { %v276_v3 = vadd.f32 %v957_v54, %v275_v42 }
 0x12f   :  { %v317_v5 = vadd.f32 %v316_v0, %v276_v3 }
 0x131   :  { %v334_v6 = vmax.f32 %v317_v5, 0.0 }
 0x134   :  { %v278_v47 = vpop.f32.mrf.mxu2  ;;  %v319_v4 = vpop.f32.mrf.mxu3 }
 0x135   :  { %v279_v7 = vadd.f32 %v957_v54, %v278_v47 }
 0x137   :  { %v320_v10 = vadd.f32 %v319_v4, %v279_v7 }
 0x139   :  { %v335_v14 = vmax.f32 %v320_v10, 0.0 }
 0x13c   :  { %v281_v50 = vpop.f32.mrf.mxu2  ;;  %v322_v12 = vpop.f32.mrf.mxu3 }
 0x13d   :  { %v282_v15 = vadd.f32 %v957_v54, %v281_v50 }
 0x13f   :  { %v323_v18 = vadd.f32 %v322_v12, %v282_v15 }
 0x141   :  { %v336_v22 = vmax.f32 %v323_v18, 0.0 }
 0x144   :  { %v284_v51 = vpop.f32.mrf.mxu2  ;;  %v325_v21 = vpop.f32.mrf.mxu3 }
 0x145   :  { %v285_v23 = vadd.f32 %v957_v54, %v284_v51 }
 0x147   :  { %v326_v26 = vadd.f32 %v325_v21, %v285_v23 }
 0x149   :  { %v337_v27 = vmax.f32 %v326_v26, 0.0 }
 0x14c   :  { %v952_v53 = vpop.f32.mrf.mxu2  ;;  %v328_v29 = vpop.f32.mrf.mxu3 }
 0x14d   :  { %v288_v28 = vadd.f32 %v957_v54, %v952_v53 }
 0x14f   :  { %v329_v30 = vadd.f32 %v328_v29, %v288_v28 }
 0x151   :  { %v338_v31 = vmax.f32 %v329_v30, 0.0 }
 0x154   :  { %v307_v56 = vpop.f32.mrf.mxu2 }
 0x155   :  { %v308_v57 = vadd.f32 %v307_v56, %v267_v55 }
 0x157   :  { %v331_v60 = vmax.f32 %v308_v57, 0.0 }
 0x159   :  { %632 = vmatmul.msk.f32.vlgmr.msrb.gmra.mxu0 %vm355_vm3, %v331_v60 }
 0x15a   :  { %565 = vmatpush.msrb.mxu0 %v521_v45 }
 0x15c   :  { %566 = vmatpush.msrb.mxu0 %v520_v46 }
 0x161   :  { %633 = vmatmul.msk.f32.gmra.mxu0 %vm355_vm3, %v332_v62 }
 0x169   :  { %634 = vmatmul.msk.f32.gmra.mxu0 %vm355_vm3, %v333_v2 }
 0x171   :  { %635 = vmatmul.msk.f32.gmra.mxu0 %vm355_vm3, %v334_v6 }
 0x179   :  { %636 = vmatmul.msk.f32.gmra.mxu0 %vm355_vm3, %v335_v14 }
 0x181   :  { %637 = vmatmul.msk.f32.gmra.mxu0 %vm355_vm3, %v336_v22 }
 0x189   :  { %638 = vmatmul.msk.f32.gmra.mxu0 %vm355_vm3, %v337_v27 }
 0x191   :  { %639 = vmatmul.msk.f32.gmra.mxu0 %vm355_vm3, %v338_v31 }
 0x1d6   :  { %v400_v33 = vpop.f32.mrf.mxu0 }
 0x1d7   :  { %v401_v34 = vadd.f32 %v684_v32, %v400_v33 }
 0x1d9   :  { %v424_v35 = vmax.f32 %v401_v34, 0.0 }
 0x1db   :  { %640 = vmatmul.msk.f32.vlgmr.msra.gmra.mxu0 %vm446_vm4, %v424_v35 }
 0x1de   :  { %v403_v36 = vpop.f32.mrf.mxu0 }
 0x1df   :  { %v404_v37 = vadd.f32 %v684_v32, %v403_v36 }
 0x1e1   :  { %v425_v38 = vmax.f32 %v404_v37, 0.0 }
 0x1e3   :  { %641 = vmatmul.msk.f32.gmra.mxu0 %vm446_vm4, %v425_v38 }
 0x1e6   :  { %v406_v39 = vpop.f32.mrf.mxu0 }
 0x1e7   :  { %v407_v40 = vadd.f32 %v684_v32, %v406_v39 }
 0x1e9   :  { %v426_v41 = vmax.f32 %v407_v40, 0.0 }
 0x1eb   :  { %642 = vmatmul.msk.f32.vlgmr.msrb.gmra.mxu1 %vm446_vm4, %v426_v41 }
 0x1ee   :  { %v409_v42 = vpop.f32.mrf.mxu0 }
 0x1ef   :  { %v410_v43 = vadd.f32 %v684_v32, %v409_v42 }
 0x1f1   :  { %v427_v44 = vmax.f32 %v410_v43, 0.0 }
 0x1f3   :  { %643 = vmatmul.msk.f32.gmra.mxu1 %vm446_vm4, %v427_v44 }
 0x1f6   :  { %v412_v47 = vpop.f32.mrf.mxu0 }
 0x1f7   :  { %v413_v48 = vadd.f32 %v684_v32, %v412_v47 }
 0x1f9   :  { %v428_v49 = vmax.f32 %v413_v48, 0.0 }
 0x1fb   :  { %644 = vmatmul.msk.f32.gmra.mxu1 %vm446_vm4, %v428_v49 }
 0x1fe   :  { %v415_v50 = vpop.f32.mrf.mxu0 }
 0x1ff   :  { %v416_v51 = vadd.f32 %v684_v32, %v415_v50 }
 0x201   :  { %v429_v52 = vmax.f32 %v416_v51, 0.0 }
 0x203   :  { %645 = vmatmul.msk.f32.gmra.mxu1 %vm446_vm4, %v429_v52 }
 0x206   :  { %v418_v53 = vpop.f32.mrf.mxu0 }
 0x207   :  { %v419_v54 = vadd.f32 %v684_v32, %v418_v53 }
 0x209   :  { %v430_v55 = vmax.f32 %v419_v54, 0.0 }
 0x20b   :  { %646 = vmatmul.msk.f32.gmra.mxu1 %vm446_vm4, %v430_v55 }
 0x20e   :  { %v421_v56 = vpop.f32.mrf.mxu0 }
 0x20f   :  { %v422_v57 = vadd.f32 %v684_v32, %v421_v56 }
 0x211   :  { %v431_v58 = vmax.f32 %v422_v57, 0.0 }
 0x213   :  { %647 = vmatmul.msk.f32.gmra.mxu1 %vm446_vm4, %v431_v58 }
 0x258   :  { %v488_v60 = vpop.f32.mrf.mxu0 }
 0x259   :  { %v489_v61 = vadd.f32 %v685_v59, %v488_v60 }
 0x25b   :  { %v512_v62 = vmax.f32 %v489_v61, 0.0 }
 0x25d   :  { %648 = vmatmul.msk.f32.vlgmr.msrb.gmra.mxu0 %vm526_vm5, %v512_v62 }
 0x260   :  { %v491_v63 = vpop.f32.mrf.mxu0 }
 0x261   :  { %v492_v0 = vadd.f32 %v685_v59, %v491_v63 }
 0x263   :  { %v513_v1 = vmax.f32 %v492_v0, 0.0 }
 0x265   :  { %649 = vmatmul.msk.f32.vlgmr.msrb.gmra.mxu3 %vm526_vm5, %v513_v1 }
 0x268   :  { %v494_v2 = vpop.f32.mrf.mxu1 }
 0x269   :  { %v495_v3 = vadd.f32 %v685_v59, %v494_v2 }
 0x26b   :  { %v514_v4 = vmax.f32 %v495_v3, 0.0 }
 0x26d   :  { %650 = vmatmul.msk.f32.gmra.mxu3 %vm526_vm5, %v514_v4 }
 0x270   :  { %v497_v5 = vpop.f32.mrf.mxu1 }
 0x271   :  { %v498_v6 = vadd.f32 %v685_v59, %v497_v5 }
 0x273   :  { %v515_v7 = vmax.f32 %v498_v6, 0.0 }
 0x275   :  { %651 = vmatmul.msk.f32.gmra.mxu3 %vm526_vm5, %v515_v7 }
 0x278   :  { %v500_v8 = vpop.f32.mrf.mxu1 }
 0x279   :  { %v501_v9 = vadd.f32 %v685_v59, %v500_v8 }
 0x27b   :  { %v516_v10 = vmax.f32 %v501_v9, 0.0 }
 0x27d   :  { %652 = vmatmul.msk.f32.gmra.mxu3 %vm526_vm5, %v516_v10 }
 0x280   :  { %v503_v11 = vpop.f32.mrf.mxu1 }
 0x281   :  { %v504_v12 = vadd.f32 %v685_v59, %v503_v11 }
 0x283   :  { %v517_v13 = vmax.f32 %v504_v12, 0.0 }
 0x285   :  { %653 = vmatmul.msk.f32.gmra.mxu3 %vm526_vm5, %v517_v13 }
 0x288   :  { %v506_v14 = vpop.f32.mrf.mxu1 }
 0x289   :  { %v507_v15 = vadd.f32 %v685_v59, %v506_v14 }
 0x28b   :  { %v518_v16 = vmax.f32 %v507_v15, 0.0 }
 0x28d   :  { %654 = vmatmul.msk.f32.gmra.mxu3 %vm526_vm5, %v518_v16 }
 0x290   :  { %v509_v17 = vpop.f32.mrf.mxu1 }
 0x291   :  { %v510_v18 = vadd.f32 %v685_v59, %v509_v17 }
 0x293   :  { %v519_v19 = vmax.f32 %v510_v18, 0.0 }
 0x295   :  { %655 = vmatmul.msk.f32.gmra.mxu3 %vm526_vm5, %v519_v19 }
 0x2da   :  { %v568_v21 = vpop.f32.mrf.mxu0 }
 0x2db   :  { %v569_v22 = vadd.f32 %v686_v20, %v568_v21 }
 0x2dd   :  { %593 = vst.msk [vmem:[%s1080_s11] sm:$0xff] %vm592_vm6, %v569_v22 }
 0x2e8   :  { %v571_v23 = vpop.f32.mrf.mxu3 }
 0x2e9   :  { %v572_v24 = vadd.f32 %v686_v20, %v571_v23 }
 0x2eb   :  { %594 = vst.msk [vmem:[%s1080_s11 + $0x8] sm:$0xff] %vm592_vm6, %v572_v24 }
 0x2f0   :  { %v574_v25 = vpop.f32.mrf.mxu3 }
 0x2f1   :  { %v575_v26 = vadd.f32 %v686_v20, %v574_v25 }
 0x2f3   :  { %595 = vst.msk [vmem:[%s1080_s11 + $0x10] sm:$0xff] %vm592_vm6, %v575_v26 }
 0x2f8   :  { %v577_v27 = vpop.f32.mrf.mxu3 }
 0x2f9   :  { %v578_v28 = vadd.f32 %v686_v20, %v577_v27 }
 0x2fb   :  { %596 = vst.msk [vmem:[%s1080_s11 + $0x18] sm:$0xff] %vm592_vm6, %v578_v28 }
 0x300   :  { %v580_v29 = vpop.f32.mrf.mxu3 }
 0x301   :  { %v581_v30 = vadd.f32 %v686_v20, %v580_v29 }
 0x303   :  { %597 = vst.msk [vmem:[%s1080_s11 + $0x20] sm:$0xff] %vm592_vm6, %v581_v30 }
 0x308   :  { %v583_v31 = vpop.f32.mrf.mxu3 }
 0x309   :  { %v584_v32 = vadd.f32 %v686_v20, %v583_v31 }
 0x30b   :  { %598 = vst.msk [vmem:[%s1080_s11 + $0x28] sm:$0xff] %vm592_vm6, %v584_v32 }
 0x310   :  { %v586_v33 = vpop.f32.mrf.mxu3 }
 0x311   :  { %v587_v34 = vadd.f32 %v686_v20, %v586_v33 }
 0x313   :  { %599 = vst.msk [vmem:[%s1080_s11 + $0x30] sm:$0xff] %vm592_vm6, %v587_v34 }
 0x318   :  { %v589_v35 = vpop.f32.mrf.mxu3 }
 0x319   :  { %v590_v36 = vadd.f32 %v686_v20, %v589_v35 }
 0x31b   :  { %600 = vst.msk [vmem:[%s1080_s11 + $0x38] sm:$0xff] %vm592_vm6, %v590_v36 }

</bundles_post_ra>
